<compile_context>
chip_gen: v6e
topology: v6e:2x2x1
jax: 0.10.0
libtpu: 0.0.40
codegen_flags: <defaults>
</compile_context>

<pallas_src>
import functools

import jax
import jax.numpy as jnp
from jax import lax
from jax.experimental import pallas as pl
from jax.experimental.pallas import tpu as pltpu


def _replicate_lanes(x, reps):
    """Tile x of shape (r, d) -> (r, reps*d) along the lane axis with O(log reps) concats."""
    if reps == 1:
        return x
    parts = []
    chunk = x
    r = reps
    while r > 0:
        if r & 1:
            parts.append(chunk)
        r >>= 1
        if r > 0:
            chunk = jnp.concatenate([chunk, chunk], axis=1)
    if len(parts) == 1:
        return parts[0]
    return jnp.concatenate(parts, axis=1)


def _rel_pos_kernel(pe_ref, out_ref, *, tq, tk, d_model, max_k, window):
    num_emb = 2 * max_k + 1
    tkd = tk * d_model

    q0 = pl.program_id(0) * tq          # first query row of this tile
    k0 = pl.program_id(1) * tk          # first key column of this tile
    qk_off = q0 - k0                    # scalar offset between the two axes

    # Lane-dense local coordinates over the (tq, tk*d_model) output block.
    r_iota = lax.broadcasted_iota(jnp.int32, (tq, tkd), 0)   # local query row
    c_iota = lax.broadcasted_iota(jnp.int32, (tq, tkd), 1)   # local lane column

    # Only `window` consecutive rows of pe can be referenced inside this tile.
    if window >= num_emb:
        lo = 0
        pe_win = pe_ref[...]                                  # (num_emb, d_model)
    else:
        lo = jnp.clip(k0 - q0 - (tq - 1), -max_k, max_k) + max_k   # first possible row
        lo = jnp.minimum(lo, num_emb - window)                     # keep slice in bounds
        pe_win = pe_ref[pl.ds(lo, window), :]                      # (window, d_model)

    # Replicate every pe row across the tk key positions of the lane axis once,
    # hoisted out of the select loop: pe_rep[e, j*d + f] = pe_win[e, f].
    pe_rep = _replicate_lanes(pe_win, tk)                          # (window, tk*d)

    big = tkd + d_model                 # sentinel > any lane column
    neg = -1                            # sentinel < any lane column

    def select_row(e, acc):
        k_emb = lo + e                                   # embedding-table row id
        t = k_emb - max_k                                # clipped relative distance
        # Lane columns whose key position j satisfies clip(j - i) == t.
        # column c belongs to key j = c // d, so "j - i == t" <=> (i + t)*d <= c < (i + t + 1)*d.
        m_lo = (r_iota + (t + qk_off)) * d_model         # first matching lane
        m_hi = m_lo + d_model                            # one past last matching lane
        if isinstance(k_emb, int):                       # fully static window
            lower = neg if k_emb == 0 else m_lo          # row 0      <=> j - i <= -max_k
            upper = big if k_emb == num_emb - 1 else m_hi  # last row <=> j - i >=  max_k
        else:
            lower = jnp.where(k_emb == 0, neg, m_lo)
            upper = jnp.where(k_emb == num_emb - 1, big, m_hi)
        mask = (c_iota >= lower) & (c_iota < upper)
        if isinstance(e, int):
            row = pe_rep[e:e + 1]                        # (1, tk*d), static slice
        else:
            row = lax.dynamic_slice_in_dim(pe_rep, e, 1, axis=0)
        return jnp.where(mask, row, acc)

    acc = jnp.zeros((tq, tkd), dtype=out_ref.dtype)
    if window <= 32:
        for e in range(window):                          # short unrolled select chain
            acc = select_row(e, acc)
    else:
        acc = lax.fori_loop(0, window, select_row, acc)

    out_ref[...] = acc


def _choose_tiles(length_q, length_k, d_model, num_emb, itemsize,
                  budget_bytes=20 * 1024 * 1024):
    """Pick (tq, tk) dividing (Lq, Lk), legal for TPU blocks, within a VMEM budget."""

    def divisors_desc(n, cap):
        return [c for c in range(min(n, cap), 0, -1) if n % c == 0]

    tq_cands = [c for c in divisors_desc(length_q, 1024) if c % 8 == 0] or [length_q]
    tk_cands = [c for c in divisors_desc(length_k, 4096)
                if (c * d_model) % 128 == 0] or [length_k]

    def estimate(tq, tk):
        tile = tq * tk * d_model
        window = min(num_emb, tq + tk - 1)
        # double-buffered output block + in-kernel iotas/acc + replicated pe window + pe
        return itemsize * (5 * tile + window * tk * d_model + 2 * num_emb * d_model)

    for tq in tq_cands:
        for tk in tk_cands:
            if estimate(tq, tk) <= budget_bytes:
                return tq, tk
    return tq_cands[-1], tk_cands[-1]


def relative_position(pe, length_q, length_k, max_k, *, block_q=None, block_k=None):
    """pe: (2*max_k+1, d_model). Returns (length_q, length_k, d_model) = pe[clip(j-i)+max_k]."""
    num_emb, d_model = pe.shape
    if num_emb != 2 * max_k + 1:
        raise ValueError("pe must have 2*max_k+1 rows")

    tq, tk = _choose_tiles(length_q, length_k, d_model, num_emb,
                           jnp.dtype(pe.dtype).itemsize)
    if block_q is not None:
        tq = block_q
    if block_k is not None:
        tk = block_k
    if length_q % tq or length_k % tk:
        raise ValueError("block sizes must divide (length_q, length_k)")
    if not (tq % 8 == 0 or tq == length_q):
        raise ValueError("block_q must be a multiple of 8 or equal length_q")
    if not ((tk * d_model) % 128 == 0 or tk == length_k):
        raise ValueError("block_k * d_model must be a multiple of 128 or equal full width")

    tkd = tk * d_model
    # Round the pe window up to a sublane multiple (harmless extra selects).
    window = min(num_emb, ((tq + tk - 1 + 7) // 8) * 8)
    grid = (length_q // tq, length_k // tk)

    kernel = functools.partial(_rel_pos_kernel, tq=tq, tk=tk, d_model=d_model,
                               max_k=max_k, window=window)

    out2d = pl.pallas_call(
        kernel,
        out_shape=jax.ShapeDtypeStruct((length_q, length_k * d_model), pe.dtype),
        grid_spec=pltpu.PrefetchScalarGridSpec(
            num_scalar_prefetch=0,
            grid=grid,
            # pe stays resident in VMEM across the whole grid (constant index map).
            in_specs=[pl.BlockSpec((num_emb, d_model), lambda i, j: (0, 0))],
            # Lane-dense output tile: minor dim tk*d_model is a multiple of 128.
            out_specs=pl.BlockSpec((tq, tkd), lambda i, j: (i, j)),
        ),
        compiler_params=pltpu.CompilerParams(
            dimension_semantics=("parallel", "parallel"),
            vmem_limit_bytes=32 * 1024 * 1024,
        ),
    )(pe)
    return out2d.reshape(length_q, length_k, d_model)


def xavier_uniform(key, shape, dtype=jnp.float32):
    # nn.init.xavier_uniform_ for a 2D (fan_out, fan_in) tensor.
    fan_out, fan_in = shape
    bound = (6.0 / (fan_in + fan_out)) ** 0.5
    return jax.random.uniform(key, shape, dtype=dtype, minval=-bound, maxval=bound)


def reference(pe, length_q, length_k, max_k):
    dist = jnp.arange(length_k)[None, :] - jnp.arange(length_q)[:, None]
    idx = jnp.clip(dist, -max_k, max_k) + max_k
    return pe[idx]


if __name__ == "__main__":
    # Test 1: module defaults at small shapes (auto-tiled, single block, full pe window).
    d_model, max_k = 32, 4
    length_q = length_k = 8
    key = jax.random.PRNGKey(0)
    pe = xavier_uniform(key, (2 * max_k + 1, d_model))

    out = jax.block_until_ready(relative_position(pe, length_q, length_k, max_k))
    ref = reference(pe, length_q, length_k, max_k)
    assert out.shape == (length_q, length_k, d_model)
    assert jnp.array_equal(out, ref)        # exact copy of table rows

    # Test 2: multi-tile grid + per-tile pe window (dynamic slice path), lane-aligned d.
    d_model2, max_k2 = 128, 16
    lq2, lk2 = 32, 64
    pe2 = xavier_uniform(jax.random.PRNGKey(1), (2 * max_k2 + 1, d_model2))
    out2 = jax.block_until_ready(
        relative_position(pe2, lq2, lk2, max_k2, block_q=8, block_k=8))
    ref2 = reference(pe2, lq2, lk2, max_k2)
    assert out2.shape == (lq2, lk2, d_model2)
    assert jnp.array_equal(out2, ref2)

    print("KERNEL_OK")
</pallas_src>

<mosaic_0001>
module attributes {stable_mosaic.version = 11 : i64} {
  func.func @_rel_pos_kernel(%arg0: i32, %arg1: i32, %arg2: memref<9x32xf32, #tpu.memory_space<vmem>>, %arg3: memref<8x256xf32, #tpu.memory_space<vmem>>) attributes {dimension_semantics = [#tpu.dimension_semantics<parallel>, #tpu.dimension_semantics<parallel>], iteration_bounds = array<i64: 1, 1>, scalar_prefetch = 0 : i64, scratch_operands = 0 : i64, tpu.core_type = #tpu.core_type<tc>, window_params = [{pipeline_mode = #tpu.pipeline_mode<synchronous>, transform_indices = @transform_0, window_bounds = array<i64: 9, 32>}, {transform_indices = @transform_1, window_bounds = array<i64: 8, 256>}]} {
    %c8_i32 = arith.constant 8 : i32
    %0 = arith.muli %arg0, %c8_i32 : i32
    %c8_i32_0 = arith.constant 8 : i32
    %1 = arith.muli %arg1, %c8_i32_0 : i32
    %2 = arith.subi %0, %1 : i32
    %3 = tpu.iota {dimensions = array<i32: 0>} : vector<8x256xi32>
    %4 = tpu.iota {dimensions = array<i32: 1>} : vector<8x256xi32>
    %c0 = arith.constant 0 : index
    %c0_1 = arith.constant 0 : index
    %5 = vector.load %arg2[%c0, %c0_1] : memref<9x32xf32, #tpu.memory_space<vmem>>, vector<9x32xf32>
    %6 = tpu.concatenate %5, %5 in 1 : vector<9x32xf32>, vector<9x32xf32> -> vector<9x64xf32>
    %7 = tpu.concatenate %6, %6 in 1 : vector<9x64xf32>, vector<9x64xf32> -> vector<9x128xf32>
    %8 = tpu.concatenate %7, %7 in 1 : vector<9x128xf32>, vector<9x128xf32> -> vector<9x256xf32>
    %cst = arith.constant 0.000000e+00 : f32
    %9 = vector.broadcast %cst : f32 to vector<8x256xf32>
    %c-4_i32 = arith.constant -4 : i32
    %10 = arith.addi %c-4_i32, %2 : i32
    %11 = vector.broadcast %10 : i32 to vector<8x256xi32>
    %12 = arith.addi %3, %11 : vector<8x256xi32>
    %c32_i32 = arith.constant 32 : i32
    %13 = vector.broadcast %c32_i32 : i32 to vector<8x256xi32>
    %14 = arith.muli %12, %13 : vector<8x256xi32>
    %c32_i32_2 = arith.constant 32 : i32
    %15 = vector.broadcast %c32_i32_2 : i32 to vector<8x256xi32>
    %16 = arith.addi %14, %15 : vector<8x256xi32>
    %c-1_i32 = arith.constant -1 : i32
    %17 = vector.broadcast %c-1_i32 : i32 to vector<8x256xi32>
    %18 = arith.cmpi sge, %4, %17 : vector<8x256xi32>
    %19 = arith.cmpi slt, %4, %16 : vector<8x256xi32>
    %20 = arith.andi %18, %19 : vector<8x256xi1>
    %21 = vector.extract_strided_slice %8 {offsets = [0, 0], sizes = [1, 256], strides = [1, 1]} : vector<9x256xf32> to vector<1x256xf32>
    %22 = vector.shape_cast %21 : vector<1x256xf32> to vector<1x256xf32>
    %23 = vector.broadcast %22 : vector<1x256xf32> to vector<8x256xf32>
    %24 = arith.select %20, %23, %9 : vector<8x256xi1>, vector<8x256xf32>
    %c-3_i32 = arith.constant -3 : i32
    %25 = arith.addi %c-3_i32, %2 : i32
    %26 = vector.broadcast %25 : i32 to vector<8x256xi32>
    %27 = arith.addi %3, %26 : vector<8x256xi32>
    %c32_i32_3 = arith.constant 32 : i32
    %28 = vector.broadcast %c32_i32_3 : i32 to vector<8x256xi32>
    %29 = arith.muli %27, %28 : vector<8x256xi32>
    %c32_i32_4 = arith.constant 32 : i32
    %30 = vector.broadcast %c32_i32_4 : i32 to vector<8x256xi32>
    %31 = arith.addi %29, %30 : vector<8x256xi32>
    %32 = arith.cmpi sge, %4, %29 : vector<8x256xi32>
    %33 = arith.cmpi slt, %4, %31 : vector<8x256xi32>
    %34 = arith.andi %32, %33 : vector<8x256xi1>
    %35 = vector.extract_strided_slice %8 {offsets = [1, 0], sizes = [1, 256], strides = [1, 1]} : vector<9x256xf32> to vector<1x256xf32>
    %36 = vector.shape_cast %35 : vector<1x256xf32> to vector<1x256xf32>
    %37 = vector.broadcast %36 : vector<1x256xf32> to vector<8x256xf32>
    %38 = arith.select %34, %37, %24 : vector<8x256xi1>, vector<8x256xf32>
    %c-2_i32 = arith.constant -2 : i32
    %39 = arith.addi %c-2_i32, %2 : i32
    %40 = vector.broadcast %39 : i32 to vector<8x256xi32>
    %41 = arith.addi %3, %40 : vector<8x256xi32>
    %c32_i32_5 = arith.constant 32 : i32
    %42 = vector.broadcast %c32_i32_5 : i32 to vector<8x256xi32>
    %43 = arith.muli %41, %42 : vector<8x256xi32>
    %c32_i32_6 = arith.constant 32 : i32
    %44 = vector.broadcast %c32_i32_6 : i32 to vector<8x256xi32>
    %45 = arith.addi %43, %44 : vector<8x256xi32>
    %46 = arith.cmpi sge, %4, %43 : vector<8x256xi32>
    %47 = arith.cmpi slt, %4, %45 : vector<8x256xi32>
    %48 = arith.andi %46, %47 : vector<8x256xi1>
    %49 = vector.extract_strided_slice %8 {offsets = [2, 0], sizes = [1, 256], strides = [1, 1]} : vector<9x256xf32> to vector<1x256xf32>
    %50 = vector.shape_cast %49 : vector<1x256xf32> to vector<1x256xf32>
    %51 = vector.broadcast %50 : vector<1x256xf32> to vector<8x256xf32>
    %52 = arith.select %48, %51, %38 : vector<8x256xi1>, vector<8x256xf32>
    %c-1_i32_7 = arith.constant -1 : i32
    %53 = arith.addi %c-1_i32_7, %2 : i32
    %54 = vector.broadcast %53 : i32 to vector<8x256xi32>
    %55 = arith.addi %3, %54 : vector<8x256xi32>
    %c32_i32_8 = arith.constant 32 : i32
    %56 = vector.broadcast %c32_i32_8 : i32 to vector<8x256xi32>
    %57 = arith.muli %55, %56 : vector<8x256xi32>
    %c32_i32_9 = arith.constant 32 : i32
    %58 = vector.broadcast %c32_i32_9 : i32 to vector<8x256xi32>
    %59 = arith.addi %57, %58 : vector<8x256xi32>
    %60 = arith.cmpi sge, %4, %57 : vector<8x256xi32>
    %61 = arith.cmpi slt, %4, %59 : vector<8x256xi32>
    %62 = arith.andi %60, %61 : vector<8x256xi1>
    %63 = vector.extract_strided_slice %8 {offsets = [3, 0], sizes = [1, 256], strides = [1, 1]} : vector<9x256xf32> to vector<1x256xf32>
    %64 = vector.shape_cast %63 : vector<1x256xf32> to vector<1x256xf32>
    %65 = vector.broadcast %64 : vector<1x256xf32> to vector<8x256xf32>
    %66 = arith.select %62, %65, %52 : vector<8x256xi1>, vector<8x256xf32>
    %c0_i32 = arith.constant 0 : i32
    %67 = arith.addi %c0_i32, %2 : i32
    %68 = vector.broadcast %67 : i32 to vector<8x256xi32>
    %69 = arith.addi %3, %68 : vector<8x256xi32>
    %c32_i32_10 = arith.constant 32 : i32
    %70 = vector.broadcast %c32_i32_10 : i32 to vector<8x256xi32>
    %71 = arith.muli %69, %70 : vector<8x256xi32>
    %c32_i32_11 = arith.constant 32 : i32
    %72 = vector.broadcast %c32_i32_11 : i32 to vector<8x256xi32>
    %73 = arith.addi %71, %72 : vector<8x256xi32>
    %74 = arith.cmpi sge, %4, %71 : vector<8x256xi32>
    %75 = arith.cmpi slt, %4, %73 : vector<8x256xi32>
    %76 = arith.andi %74, %75 : vector<8x256xi1>
    %77 = vector.extract_strided_slice %8 {offsets = [4, 0], sizes = [1, 256], strides = [1, 1]} : vector<9x256xf32> to vector<1x256xf32>
    %78 = vector.shape_cast %77 : vector<1x256xf32> to vector<1x256xf32>
    %79 = vector.broadcast %78 : vector<1x256xf32> to vector<8x256xf32>
    %80 = arith.select %76, %79, %66 : vector<8x256xi1>, vector<8x256xf32>
    %c1_i32 = arith.constant 1 : i32
    %81 = arith.addi %c1_i32, %2 : i32
    %82 = vector.broadcast %81 : i32 to vector<8x256xi32>
    %83 = arith.addi %3, %82 : vector<8x256xi32>
    %c32_i32_12 = arith.constant 32 : i32
    %84 = vector.broadcast %c32_i32_12 : i32 to vector<8x256xi32>
    %85 = arith.muli %83, %84 : vector<8x256xi32>
    %c32_i32_13 = arith.constant 32 : i32
    %86 = vector.broadcast %c32_i32_13 : i32 to vector<8x256xi32>
    %87 = arith.addi %85, %86 : vector<8x256xi32>
    %88 = arith.cmpi sge, %4, %85 : vector<8x256xi32>
    %89 = arith.cmpi slt, %4, %87 : vector<8x256xi32>
    %90 = arith.andi %88, %89 : vector<8x256xi1>
    %91 = vector.extract_strided_slice %8 {offsets = [5, 0], sizes = [1, 256], strides = [1, 1]} : vector<9x256xf32> to vector<1x256xf32>
    %92 = vector.shape_cast %91 : vector<1x256xf32> to vector<1x256xf32>
    %93 = vector.broadcast %92 : vector<1x256xf32> to vector<8x256xf32>
    %94 = arith.select %90, %93, %80 : vector<8x256xi1>, vector<8x256xf32>
    %c2_i32 = arith.constant 2 : i32
    %95 = arith.addi %c2_i32, %2 : i32
    %96 = vector.broadcast %95 : i32 to vector<8x256xi32>
    %97 = arith.addi %3, %96 : vector<8x256xi32>
    %c32_i32_14 = arith.constant 32 : i32
    %98 = vector.broadcast %c32_i32_14 : i32 to vector<8x256xi32>
    %99 = arith.muli %97, %98 : vector<8x256xi32>
    %c32_i32_15 = arith.constant 32 : i32
    %100 = vector.broadcast %c32_i32_15 : i32 to vector<8x256xi32>
    %101 = arith.addi %99, %100 : vector<8x256xi32>
    %102 = arith.cmpi sge, %4, %99 : vector<8x256xi32>
    %103 = arith.cmpi slt, %4, %101 : vector<8x256xi32>
    %104 = arith.andi %102, %103 : vector<8x256xi1>
    %105 = vector.extract_strided_slice %8 {offsets = [6, 0], sizes = [1, 256], strides = [1, 1]} : vector<9x256xf32> to vector<1x256xf32>
    %106 = vector.shape_cast %105 : vector<1x256xf32> to vector<1x256xf32>
    %107 = vector.broadcast %106 : vector<1x256xf32> to vector<8x256xf32>
    %108 = arith.select %104, %107, %94 : vector<8x256xi1>, vector<8x256xf32>
    %c3_i32 = arith.constant 3 : i32
    %109 = arith.addi %c3_i32, %2 : i32
    %110 = vector.broadcast %109 : i32 to vector<8x256xi32>
    %111 = arith.addi %3, %110 : vector<8x256xi32>
    %c32_i32_16 = arith.constant 32 : i32
    %112 = vector.broadcast %c32_i32_16 : i32 to vector<8x256xi32>
    %113 = arith.muli %111, %112 : vector<8x256xi32>
    %c32_i32_17 = arith.constant 32 : i32
    %114 = vector.broadcast %c32_i32_17 : i32 to vector<8x256xi32>
    %115 = arith.addi %113, %114 : vector<8x256xi32>
    %116 = arith.cmpi sge, %4, %113 : vector<8x256xi32>
    %117 = arith.cmpi slt, %4, %115 : vector<8x256xi32>
    %118 = arith.andi %116, %117 : vector<8x256xi1>
    %119 = vector.extract_strided_slice %8 {offsets = [7, 0], sizes = [1, 256], strides = [1, 1]} : vector<9x256xf32> to vector<1x256xf32>
    %120 = vector.shape_cast %119 : vector<1x256xf32> to vector<1x256xf32>
    %121 = vector.broadcast %120 : vector<1x256xf32> to vector<8x256xf32>
    %122 = arith.select %118, %121, %108 : vector<8x256xi1>, vector<8x256xf32>
    %c4_i32 = arith.constant 4 : i32
    %123 = arith.addi %c4_i32, %2 : i32
    %124 = vector.broadcast %123 : i32 to vector<8x256xi32>
    %125 = arith.addi %3, %124 : vector<8x256xi32>
    %c32_i32_18 = arith.constant 32 : i32
    %126 = vector.broadcast %c32_i32_18 : i32 to vector<8x256xi32>
    %127 = arith.muli %125, %126 : vector<8x256xi32>
    %128 = arith.cmpi sge, %4, %127 : vector<8x256xi32>
    %c288_i32 = arith.constant 288 : i32
    %129 = vector.broadcast %c288_i32 : i32 to vector<8x256xi32>
    %130 = arith.cmpi slt, %4, %129 : vector<8x256xi32>
    %131 = arith.andi %128, %130 : vector<8x256xi1>
    %132 = vector.extract_strided_slice %8 {offsets = [8, 0], sizes = [1, 256], strides = [1, 1]} : vector<9x256xf32> to vector<1x256xf32>
    %133 = vector.shape_cast %132 : vector<1x256xf32> to vector<1x256xf32>
    %134 = vector.broadcast %133 : vector<1x256xf32> to vector<8x256xf32>
    %135 = arith.select %131, %134, %122 : vector<8x256xi1>, vector<8x256xf32>
    %c0_19 = arith.constant 0 : index
    %c0_20 = arith.constant 0 : index
    %136 = vector.load %arg3[%c0_19, %c0_20] : memref<8x256xf32, #tpu.memory_space<vmem>>, vector<8x256xf32>
    tpu.vector_store %arg3[%c0_19, %c0_20], %135 {strides = array<i32>} : memref<8x256xf32, #tpu.memory_space<vmem>>, vector<8x256xf32>,
    return
  }
  func.func @transform_0(%arg0: i32, %arg1: i32) -> (i32, i32) {
    %c0_i32 = arith.constant 0 : i32
    %c0_i32_0 = arith.constant 0 : i32
    %c0_i32_1 = arith.constant 0 : i32
    return %c0_i32, %c0_i32_0 : i32, i32
  }
  func.func @transform_1(%arg0: i32, %arg1: i32) -> (i32, i32) {
    %c0_i32 = arith.constant 0 : i32
    return %arg0, %arg1 : i32, i32
  }
}

</mosaic_0001>

<bundles_post_ra>
// kernel: tpu_custom_call.1
= control target key start
LH: loop header
LB: loop body
LE: loop exit
PB: predicated region body
PF: predicated region fallthrough
CT: control target
= control target key end

     0   :  { %6 = vsyncpa [#allocation3], 0  ;;  %s483_s0 = inlined_call_operand.hbm [shape: f32[9,32], index: 0, kind: input, shape index: {}]   ;;  %s484_s1 = inlined_call_operand.hbm [shape: f32[8,256], index: 1, kind: output, shape index: {}]  }
   0x1   :  { %7 = vsyncpa [#allocation4], 0  ;;  %s273_s6 = smov [#allocation2]  }
   0x2   :  { %s13_s7 = sshll.u32 %s273_s6, 4  ;;  %s14_s7 = int_to_ptr.vmem [resolvable:$true] %s13_s7 }
   0x3   :  { %s237_s8 = scalar_lea.vmem %s14_s7, 256  ;;  %p242_p1 = scmp.lt.s32.totalorder %s14_s7, %s14_s7 }
   0x4   :  { %p238_p0 = scmp.ne.s32.totalorder %s14_s7, %s237_s8  ;;  %p243_p2 = scmp.lt.s32.totalorder %s237_s8, %s237_s8 }
   0x6   :  { %p244_p3 = por %p243_p2, %p242_p1 }
   0x8   :  { %p245_p4 = pnand %p244_p3, %p238_p0 }
   0xa   :  { %248 = shalt.err (!%p245_p4)
}
   0xb   :  { %s274_s9 = smov 128   ;;  %s275_s10 = smov 8  }
   0xc   :  { %19 = dma.hbm_to_vmem [thread:$0]  %s483_s0, 256, %s14_s7, [#allocation3], %s274_s9, %s274_s9, %s275_s10  }
   0xd   :  { %269 = dma.done.wait [#allocation3], 256  }
   0xe   :  { %270 = vsyncadd [#allocation3], 4294967040  ;;  %v31_v0 = vld [vmem:[#allocation2] sm:$0xff]  ;;  %s276_s13 = smov 32   ;;  %v32_v1 = vld [vmem:[#allocation2 + $0x8] sm:$0x1]  ;;  %v26_v6 = vlaneseq }
   0xf   :  { %35 = vrot.lane.b32.xlu0 %v31_v0, %s276_s13  ;;  %vm41_vm0 = vcmask 261120   ;;  %s277_s14 = smov 64   ;;  %v495_v46 = vmov 0  ;;  %v498_v50 = vmov 0  ;;  %s278_s0 = smov [#allocation5]  }
  0x10   :  { %v298_v7 = vshrl.u32 %v26_v6, 7  ;;  %v303_v12 = vand.u32 127, %v26_v6  ;;  %s214_s15 = sshll.u32 %s278_s0, 4  ;;  %s215_s15 = int_to_ptr.vmem [resolvable:$true] %s214_s15 }
  0x11   :  { %s249_s16 = scalar_lea.vmem %s215_s15, 256  ;;  %p254_p6 = scmp.lt.s32.totalorder %s215_s15, %s215_s15 }
  0x12   :  { %v74_v8 = vadd.s32 4294967293, %v298_v7  ;;  %v91_v9 = vadd.s32 4294967294, %v298_v7  ;;  %v108_v11 = vadd.s32 4294967295, %v298_v7  ;;  %v57_v13 = vadd.s32 4294967292, %v298_v7  ;;  %p250_p5 = scmp.ne.s32.totalorder %s215_s15, %s249_s16  ;;  %p255_p7 = scmp.lt.s32.totalorder %s249_s16, %s249_s16 }
  0x13   :  { %37 = vrot.lane.b32.xlu0 %v32_v1, %s276_s13  ;;  %v141_v17 = vadd.s32 1, %v298_v7  ;;  %v308_v18 = vadd.s32 128, %v303_v12  ;;  %v125_v21 = vmul.u32 32, %v298_v7  ;;  %v158_v22 = vadd.s32 2, %v298_v7 }
  0x14   :  { %v75_v10 = vmul.u32 32, %v74_v8  ;;  %v92_v14 = vmul.u32 32, %v91_v9  ;;  %v119_v23 = vsub.s32 3, %v298_v7  ;;  %v135_v24 = vsub.s32 4, %v298_v7  ;;  %p256_p8 = por %p255_p7, %p254_p6 }
  0x15   :  { %v109_v16 = vmul.u32 32, %v108_v11  ;;  %v58_v19 = vmul.u32 32, %v57_v13  ;;  %v175_v27 = vadd.s32 3, %v298_v7  ;;  %v68_v29 = vsub.s32 0, %v298_v7 }
  0x16   :  { %v76_v15 = vadd.s32 32, %v75_v10  ;;  %v93_v20 = vadd.s32 32, %v92_v14  ;;  %vm77_vm2 = vcmp.ge.s32.totalorder %v303_v12, %v75_v10  ;;  %v142_v26 = vmul.u32 32, %v141_v17  ;;  %p257_p9 = pnand %p256_p8, %p250_p5 }
  0x17   :  { %v110_v25 = vadd.s32 32, %v109_v16  ;;  %v59_v28 = vadd.s32 32, %v58_v19  ;;  %vm78_vm4 = vcmp.ge.s32.totalorder %v308_v18, %v75_v10  ;;  %vm94_vm6 = vcmp.ge.s32.totalorder %v303_v12, %v92_v14 }
  0x18   :  { %vm79_vm3 = vcmp.lt.s32.totalorder %v303_v12, %v76_v15  ;;  %vm80_vm5 = vcmp.lt.s32.totalorder %v308_v18, %v76_v15  ;;  %vm96_vm7 = vcmp.lt.s32.totalorder %v303_v12, %v93_v20  ;;  %v126_v30 = vadd.s32 32, %v125_v21 }
  0x19   :  { %v159_v31 = vmul.u32 32, %v158_v22  ;;  %vm322_vm8 = vmand %vm77_vm2, %vm79_vm3  ;;  %v85_v33 = vsub.s32 1, %v298_v7  ;;  %vm95_vm9 = vcmp.ge.s32.totalorder %v308_v18, %v92_v14  ;;  %vm97_vm10 = vcmp.lt.s32.totalorder %v308_v18, %v93_v20 }
  0x1a   :  { %v102_v34 = vsub.s32 2, %v298_v7  ;;  %vm330_vm11 = vmand %vm78_vm4, %vm80_vm5  ;;  %vm111_vm12 = vcmp.ge.s32.totalorder %v303_v12, %v109_v16  ;;  %vm113_vm13 = vcmp.lt.s32.totalorder %v303_v12, %v110_v25  ;;  %v143_v36 = vadd.s32 32, %v142_v26 }
  0x1b   :  { %v176_v37 = vmul.u32 32, %v175_v27  ;;  %vm336_vm14 = vmand %vm94_vm6, %vm96_vm7  ;;  %vm112_vm15 = vcmp.ge.s32.totalorder %v308_v18, %v109_v16  ;;  %v152_v39 = vsub.s32 5, %v298_v7  ;;  %v169_v40 = vsub.s32 6, %v298_v7 }
  0x1c   :  { %vm345_vm3 = vmand %vm95_vm9, %vm97_vm10  ;;  %vm127_vm4 = vcmp.ge.s32.totalorder %v303_v12, %v125_v21  ;;  %vm129_vm5 = vcmp.lt.s32.totalorder %v303_v12, %v126_v30  ;;  %v160_v42 = vadd.s32 32, %v159_v31  ;;  %vm130_vm9 = vcmp.lt.s32.totalorder %v308_v18, %v126_v30 }
  0x1d   :  { %vm354_vm7 = vmand %vm111_vm12, %vm113_vm13  ;;  %v192_v44 = vadd.s32 4, %v298_v7  ;;  %vm144_vm6 = vcmp.ge.s32.totalorder %v303_v12, %v142_v26  ;;  %vm146_vm12 = vcmp.lt.s32.totalorder %v303_v12, %v143_v36  ;;  %v177_v47 = vadd.s32 32, %v176_v37 }
  0x1e   :  { %v186_v48 = vsub.s32 7, %v298_v7  ;;  %vm497_vm13 = vcmask 523264   ;;  %vm374_vm2 = vmand %vm127_vm4, %vm129_vm5  ;;  %vm163_vm5 = vcmp.lt.s32.totalorder %v303_v12, %v160_v42  ;;  %vm164_vm1 = vcmp.lt.s32.totalorder %v308_v18, %v160_v42 }
  0x1f   :  { %v499_v50 = vsel %vm374_vm2, 4294967295, %v498_v50  ;;  %vm179_vm2 = vcmp.ge.s32.totalorder %v308_v18, %v176_v37  ;;  %v193_v55 = vmul.u32 32, %v192_v44 }
  0x81   :  { %v36_v2 = vpop.permute.xlu0 %35 }
  0x82   :  { %v292_v3 = vsel %vm41_vm0, %v31_v0, %v36_v2 }
  0x83   :  { %46 = vrot.lane.b32.xlu1 %v292_v3, %s277_s14 }
  0x85   :  { %v38_v4 = vpop.permute.xlu0 %37 }
  0x86   :  { %v295_v5 = vsel %vm41_vm0, %v32_v1, %v38_v4  ;;  %vm114_vm0 = vcmp.lt.s32.totalorder %v308_v18, %v110_v25 }
  0x87   :  { %48 = vrot.lane.b32.xlu1 %v295_v5, %s277_s14  ;;  %vm363_vm10 = vmand %vm112_vm15, %vm114_vm0  ;;  %vm180_vm0 = vcmp.lt.s32.totalorder %v303_v12, %v177_v47 }
  0x88   :  { %v496_v46 = vsel %vm363_vm10, 4294967295, %v495_v46  ;;  %vm393_vm15 = vmand %vm144_vm6, %vm146_vm12  ;;  %vm507_vm6 = vcmp.lt.s32.totalorder %v308_v18, %v143_v36  ;;  %vm508_vm12 = vcmp.ge.s32.totalorder %v308_v18, %v142_v26 }
  0x89   :  { %vm408_vm4 = vmand %vm508_vm12, %vm507_vm6  ;;  %vm181_vm6 = vcmp.lt.s32.totalorder %v308_v18, %v177_v47  ;;  %vm518_vm12 = vcmask 523264  }
  0xf5   :  { %v47_v45 = vpop.permute.xlu1 %46 }
  0xf6   :  { %v53_v49 = vsel %vm497_vm13, %v292_v3, %v47_v45  ;;  %vm500_vm13 = vcmp.ge.s32.totalorder %v308_v18, %v125_v21 }
  0xf7   :  { %v69_v51 = vrot.slane %v53_v49, %v68_v29  ;;  %v86_v52 = vrot.slane %v53_v49, %v85_v33  ;;  %vm387_vm10 = vmand %vm500_vm13, %vm130_vm9  ;;  %vm505_vm9 = vcmp.lt.s32.totalorder %v303_v12, %v59_v28  ;;  %vm506_vm13 = vcmp.lt.s32.totalorder %v308_v18, %v59_v28 }
  0xf8   :  { %v103_v58 = vrot.slane %v53_v49, %v102_v34  ;;  %v120_v61 = vrot.slane %v53_v49, %v119_v23  ;;  %v136_v1 = vrot.slane %v53_v49, %v135_v24  ;;  %v153_v10 = vrot.slane %v53_v49, %v152_v39 }
  0xf9   :  { %v70_v56 = vsel %vm505_vm9, %v69_v51, 0.0  ;;  %v71_v57 = vsel %vm506_vm13, %v69_v51, 0.0  ;;  %v49_v59 = vpop.permute.xlu1 %48  ;;  %vm511_vm9 = vcmp.ge.s32.totalorder %v303_v12, %v159_v31  ;;  %v170_v15 = vrot.slane %v53_v49, %v169_v40 }
  0xfa   :  { %v87_v62 = vsel %vm322_vm8, %v86_v52, %v70_v56  ;;  %v88_v63 = vsel %vm330_vm11, %v86_v52, %v71_v57  ;;  %vm423_vm13 = vmand %vm511_vm9, %vm163_vm5  ;;  %vm514_vm8 = vcmp.ge.s32.totalorder %v308_v18, %v159_v31  ;;  %vm517_vm5 = vnez %v496_v46 }
  0xfb   :  { %v104_v2 = vsel %vm336_vm14, %v103_v58, %v87_v62  ;;  %v105_v3 = vsel %vm345_vm3, %v103_v58, %v88_v63  ;;  %vm438_vm11 = vmand %vm514_vm8, %vm164_vm1  ;;  %v54_v9 = vsel %vm518_vm12, %v295_v5, %v49_v59  ;;  %vm519_vm14 = vcmp.ge.s32.totalorder %v303_v12, %v176_v37 }
  0xfc   :  { %v121_v6 = vsel %vm354_vm7, %v120_v61, %v104_v2  ;;  %v122_v8 = vsel %vm517_vm5, %v120_v61, %v105_v3  ;;  %vm450_vm3 = vmand %vm519_vm14, %vm180_vm0  ;;  %vm522_vm1 = vnez %v499_v50  ;;  %vm194_vm9 = vcmp.ge.s32.totalorder %v303_v12, %v193_v55 }
  0xfd   :  { %v137_v13 = vsel %vm522_vm1, %v136_v1, %v121_v6  ;;  %v138_v14 = vsel %vm387_vm10, %v136_v1, %v122_v8  ;;  %vm460_vm7 = vmand %vm179_vm2, %vm181_vm6  ;;  %v187_v19 = vrot.slane %v53_v49, %v186_v48  ;;  %vm195_vm10 = vcmp.ge.s32.totalorder %v308_v18, %v193_v55 }
  0xfe   :  { %v154_v5 = vsel %vm393_vm15, %v153_v10, %v137_v13  ;;  %v155_v17 = vsel %vm408_vm4, %v153_v10, %v138_v14  ;;  %v203_v20 = vrot.slane %v54_v9, %v68_v29 }
  0xff   :  { %v171_v21 = vsel %vm423_vm13, %v170_v15, %v154_v5  ;;  %v172_v12 = vsel %vm438_vm11, %v170_v15, %v155_v17 }
 0x100   :  { %v188_v22 = vsel %vm450_vm3, %v187_v19, %v171_v21  ;;  %v189_v23 = vsel %vm460_vm7, %v187_v19, %v172_v12 }
 0x101   :  { %v204_v24 = vsel %vm194_vm9, %v203_v20, %v188_v22  ;;  %v205_v25 = vsel %vm195_vm10, %v203_v20, %v189_v23 }
 0x102   :  { %206 = vst [vmem:[#allocation5] sm:$0xff] %v204_v24  ;;  %207 = vst [vmem:[#allocation5 + $0x8] sm:$0xff] %v205_v25 }
 0x103   :  { %260 = shalt.err (!%p257_p9)
}
 0x104   :  { %217 = dma.vmem_to_hbm [thread:$0]  %s215_s15, 256, %s484_s1, [#allocation4]  }
 0x105   :  { %271 = dma.done.wait [#allocation4], 256  }
 0x106   :  { %272 = vsyncadd [#allocation4], 4294967040 }
 0x107   :  { %221 = vsyncpa [#allocation3], 1 }
 0x108   :  { %222 = vsyncpa [#allocation4], 1 }

</bundles_post_ra>
